<compile_context>
chip_gen: v7x
topology: tpu7x:2x2x1
jax: 0.10.0
libtpu: 0.0.40
codegen_flags: <defaults>
</compile_context>

<pallas_src>
import functools

import jax
import jax.numpy as jnp
from jax.experimental import pallas as pl
from jax.experimental.pallas import tpu as pltpu


def _label_smoothing_kernel(pred_ref, tgt_ref, loss_ref, *, n_rows, tile_n,
                            smooth_val, confidence):
    # pred_ref: (T, C) logits (native dtype), tgt_ref: (T, 1) int32,
    # loss_ref: (T, 1) f32 per-row loss (0 for rows past the real batch).
    x = pred_ref[...]                                             # (T, C) native
    # Row max on the native tile; upcast folded into the subtraction so only
    # one (T, C) f32 buffer is live.
    m = jnp.max(x, axis=-1, keepdims=True).astype(jnp.float32)    # (T, 1)  XLU
    z = x.astype(jnp.float32) - m                                 # (T, C)  VPU
    lse = jnp.log(jnp.sum(jnp.exp(z), axis=-1, keepdims=True))    # (T, 1)  EUP+XLU

    # Smoothing weights sum to 1, so the smoothed NLL collapses to a single
    # weighted reduction:
    #   loss = -sum_c w_c * (z_c - lse) = lse - sum_c w_c * z_c
    #   w_c  = smooth_val + (confidence - smooth_val) * [c == target]
    col = jax.lax.broadcasted_iota(jnp.int32, z.shape, 1)         # (T, C)
    w = jnp.where(col == tgt_ref[...], confidence, smooth_val)    # (T, C)
    wz = jnp.sum(w * z, axis=-1, keepdims=True)                   # (T, 1)  XLU
    loss = lse - wz                                               # (T, 1)

    # TODO(synk): self.weight is None in this module config; a class-weight
    # vector would be an extra tiny VMEM input folded into `w` here.

    # Ragged tail: zero out rows past the true batch size.  `pred` is NOT
    # padded in HBM; the final block's out-of-bounds rows hold unspecified
    # data, and jnp.where is a select, so any NaN/Inf there never escapes.
    row = (pl.program_id(0) * tile_n
           + jax.lax.broadcasted_iota(jnp.int32, loss.shape, 0))  # (T, 1)
    loss_ref[...] = jnp.where(row < n_rows, loss, 0.0)


def label_smoothing_loss(pred, target, *, num_classes, smoothing=0.0,
                         tile_n=None):
    """pred: (N, C) logits (f32 or bf16), target: (N,) int class ids -> scalar."""
    assert 0.0 <= smoothing < 1.0
    n, c = pred.shape
    assert c == num_classes
    confidence = 1.0 - smoothing
    # Same expression as the PyTorch module (raises if num_classes == 1, as torch does).
    smooth_val = smoothing / (num_classes - 1)

    itemsize = pred.dtype.itemsize
    if tile_n is None:
        # Honest VMEM accounting: double-buffered native pred block plus ~4
        # (T, C) 32-bit temporaries (z, exp(z), iota, weights).  20 MiB keeps a
        # comfortable margin on v7x (64 MiB physical) and v5e/v6e.
        budget = 20 * 1024 * 1024
        per_row_bytes = c * (2 * itemsize + 4 * 4)
        tile_n = (budget // max(1, per_row_bytes) // 8) * 8
        tile_n = max(8, min(tile_n, 8192))
        # Guarantee >= 2 grid steps when possible so the "parallel" grid axis
        # actually shards across both v7x TensorCores.
        if n > 8:
            tile_n = min(tile_n, ((pl.cdiv(n, 2) + 7) // 8) * 8)
        tile_n = min(tile_n, ((n + 7) // 8) * 8)
    assert tile_n % 8 == 0 and tile_n >= 8

    num_tiles = pl.cdiv(n, tile_n)
    n_out = num_tiles * tile_n

    # Only the tiny target vector is padded to the grid extent (pred is not).
    target_2d = jnp.pad(target.astype(jnp.int32),
                        (0, n_out - n)).reshape(n_out, 1)

    kernel = functools.partial(
        _label_smoothing_kernel, n_rows=n, tile_n=tile_n,
        smooth_val=smooth_val, confidence=confidence)

    # Explicit VMEM limit sized from the real working set (safe <= v7x's 64 MiB).
    est_vmem = 2 * tile_n * c * itemsize + 4 * tile_n * c * 4 + 8 * tile_n * 4
    vmem_limit = int(min(max(int(est_vmem * 1.5), 32 * 1024 * 1024),
                         56 * 1024 * 1024))

    # TODO(synk): for very large class counts (30k+ vocab) the class axis
    # should also be tiled as a trailing "arbitrary" grid axis with an online
    # logsumexp ((T,1) m/l scratch + pl.when init/finalize); here a full class
    # row fits one VMEM block.
    per_row_loss = pl.pallas_call(
        kernel,
        out_shape=jax.ShapeDtypeStruct((n_out, 1), jnp.float32),
        grid=(num_tiles,),
        in_specs=[
            pl.BlockSpec((tile_n, c), lambda i: (i, 0)),   # pred, native dtype
            pl.BlockSpec((tile_n, 1), lambda i: (i, 0)),   # target ids
        ],
        out_specs=pl.BlockSpec((tile_n, 1), lambda i: (i, 0)),
        compiler_params=pltpu.CompilerParams(
            dimension_semantics=("parallel",),
            vmem_limit_bytes=vmem_limit),
    )(pred, target_2d)

    # Masked rows are exactly 0, so a full sum / N equals the mean over the
    # real rows; tiny, done in plain JAX so the grid axis stays parallel.
    return jnp.sum(per_row_loss) / n


def _reference_loss(pred, target, *, num_classes, smoothing=0.0):
    confidence = 1.0 - smoothing
    logp = jax.nn.log_softmax(pred.astype(jnp.float32), axis=-1)
    smooth_val = smoothing / (num_classes - 1)
    true_dist = jnp.full_like(logp, smooth_val)
    true_dist = true_dist.at[jnp.arange(pred.shape[0]), target].set(confidence)
    return jnp.mean(jnp.sum(-true_dist * logp, axis=-1))


if __name__ == "__main__":
    key = jax.random.PRNGKey(0)
    k_pred, k_tgt = jax.random.split(key)

    # Small shapes: batch 30 (non-divisible -> ragged final block), 128 classes.
    N, C = 30, 128
    smoothing = 0.1

    pred = jax.random.normal(k_pred, (N, C), dtype=jnp.float32)
    target = jax.random.randint(k_tgt, (N,), 0, C, dtype=jnp.int32)

    # Default tile sizing (multi-step grid + ragged tail at this shape).
    loss = jax.block_until_ready(
        label_smoothing_loss(pred, target, num_classes=C, smoothing=smoothing))
    ref = _reference_loss(pred, target, num_classes=C, smoothing=smoothing)
    assert jnp.allclose(loss, ref, rtol=1e-5, atol=1e-5), (loss, ref)

    # Forced tiny tile: 4 grid steps, last one ragged (rows 24..29 valid).
    loss_t8 = jax.block_until_ready(
        label_smoothing_loss(pred, target, num_classes=C, smoothing=smoothing,
                             tile_n=8))
    assert jnp.allclose(loss_t8, ref, rtol=1e-5, atol=1e-5), (loss_t8, ref)

    # smoothing = 0 (pure one-hot / cross-entropy) path.
    loss0 = jax.block_until_ready(
        label_smoothing_loss(pred, target, num_classes=C, smoothing=0.0))
    ref0 = _reference_loss(pred, target, num_classes=C, smoothing=0.0)
    assert jnp.allclose(loss0, ref0, rtol=1e-5, atol=1e-5), (loss0, ref0)

    # bf16 logits keep their native dtype across the HBM->VMEM DMA.
    pred_bf16 = pred.astype(jnp.bfloat16)
    loss_bf = jax.block_until_ready(
        label_smoothing_loss(pred_bf16, target, num_classes=C,
                             smoothing=smoothing))
    ref_bf = _reference_loss(pred_bf16, target, num_classes=C,
                             smoothing=smoothing)
    assert jnp.allclose(loss_bf, ref_bf, rtol=1e-2, atol=1e-2), (loss_bf, ref_bf)

    print("KERNEL_OK")
</pallas_src>

<mosaic_0001>
module attributes {stable_mosaic.version = 11 : i64} {
  func.func @_label_smoothing_kernel(%arg0: i32, %arg1: memref<16x128xf32, #tpu.memory_space<vmem>>, %arg2: memref<16x1xi32, #tpu.memory_space<vmem>>, %arg3: memref<16x1xf32, #tpu.memory_space<vmem>>) attributes {dimension_semantics = [#tpu.dimension_semantics<parallel>], iteration_bounds = array<i64: 2>, scalar_prefetch = 0 : i64, scratch_operands = 0 : i64, tpu.core_type = #tpu.core_type<tc>, window_params = [{transform_indices = @transform_0, window_bounds = array<i64: 16, 128>}, {transform_indices = @transform_1, window_bounds = array<i64: 16, 1>}, {transform_indices = @transform_2, window_bounds = array<i64: 16, 1>}]} {
    %c0 = arith.constant 0 : index
    %c0_0 = arith.constant 0 : index
    %0 = vector.load %arg1[%c0, %c0_0] : memref<16x128xf32, #tpu.memory_space<vmem>>, vector<16x128xf32>
    %cst = arith.constant dense<0xFF800000> : vector<16xf32>
    %1 = vector.multi_reduction <maximumf>, %0, %cst [1] : vector<16x128xf32> to vector<16xf32>
    %2 = vector.shape_cast %1 : vector<16xf32> to vector<16x1xf32>
    %3 = vector.broadcast %2 : vector<16x1xf32> to vector<16x128xf32>
    %4 = arith.subf %0, %3 : vector<16x128xf32>
    %5 = math.exp %4 : vector<16x128xf32>
    %cst_1 = arith.constant dense<0.000000e+00> : vector<16xf32>
    %6 = vector.multi_reduction <add>, %5, %cst_1 [1] : vector<16x128xf32> to vector<16xf32>
    %7 = vector.shape_cast %6 : vector<16xf32> to vector<16x1xf32>
    %8 = math.log %7 : vector<16x1xf32>
    %9 = tpu.iota {dimensions = array<i32: 1>} : vector<16x128xi32>
    %c0_2 = arith.constant 0 : index
    %c0_3 = arith.constant 0 : index
    %10 = vector.load %arg2[%c0_2, %c0_3] : memref<16x1xi32, #tpu.memory_space<vmem>>, vector<16x1xi32>
    %11 = vector.broadcast %10 : vector<16x1xi32> to vector<16x128xi32>
    %12 = arith.cmpi eq, %9, %11 : vector<16x128xi32>
    %cst_4 = arith.constant 0.899999976 : f32
    %cst_5 = arith.constant 7.87401571E-4 : f32
    %13 = vector.broadcast %cst_4 : f32 to vector<16x128xf32>
    %14 = vector.broadcast %cst_5 : f32 to vector<16x128xf32>
    %15 = arith.select %12, %13, %14 : vector<16x128xi1>, vector<16x128xf32>
    %16 = arith.mulf %15, %4 : vector<16x128xf32>
    %cst_6 = arith.constant dense<0.000000e+00> : vector<16xf32>
    %17 = vector.multi_reduction <add>, %16, %cst_6 [1] : vector<16x128xf32> to vector<16xf32>
    %18 = vector.shape_cast %17 : vector<16xf32> to vector<16x1xf32>
    %19 = arith.subf %8, %18 : vector<16x1xf32>
    %c16_i32 = arith.constant 16 : i32
    %20 = arith.muli %arg0, %c16_i32 : i32
    %21 = tpu.iota {dimensions = array<i32: 0>} : vector<16x1xi32>
    %22 = vector.broadcast %20 : i32 to vector<16x1xi32>
    %23 = arith.addi %22, %21 : vector<16x1xi32>
    %c30_i32 = arith.constant 30 : i32
    %24 = vector.broadcast %c30_i32 : i32 to vector<16x1xi32>
    %25 = arith.cmpi slt, %23, %24 : vector<16x1xi32>
    %cst_7 = arith.constant 0.000000e+00 : f32
    %26 = vector.broadcast %cst_7 : f32 to vector<16x1xf32>
    %27 = arith.select %25, %19, %26 : vector<16x1xi1>, vector<16x1xf32>
    %c0_8 = arith.constant 0 : index
    %c0_9 = arith.constant 0 : index
    %28 = vector.load %arg3[%c0_8, %c0_9] : memref<16x1xf32, #tpu.memory_space<vmem>>, vector<16x1xf32>
    tpu.vector_store %arg3[%c0_8, %c0_9], %27 {strides = array<i32>} : memref<16x1xf32, #tpu.memory_space<vmem>>, vector<16x1xf32>,
    return
  }
  func.func @transform_0(%arg0: i32) -> (i32, i32) {
    %c0_i32 = arith.constant 0 : i32
    %c0_i32_0 = arith.constant 0 : i32
    return %arg0, %c0_i32 : i32, i32
  }
  func.func @transform_1(%arg0: i32) -> (i32, i32) {
    %c0_i32 = arith.constant 0 : i32
    %c0_i32_0 = arith.constant 0 : i32
    return %arg0, %c0_i32 : i32, i32
  }
  func.func @transform_2(%arg0: i32) -> (i32, i32) {
    %c0_i32 = arith.constant 0 : i32
    %c0_i32_0 = arith.constant 0 : i32
    return %arg0, %c0_i32 : i32, i32
  }
}

</mosaic_0001>

<bundles_post_ra>
// kernel: tpu_custom_call.1
= control target key start
LH: loop header
LB: loop body
LE: loop exit
PB: predicated region body
PF: predicated region fallthrough
CT: control target
= control target key end

     0   :  { %s352_s9 = smov 0   ;;  %s381_s0 = inlined_call_operand.vmem [shape: f32[30,128], index: 0, kind: input, shape index: {}]   ;;  %s382_s1 = inlined_call_operand.vmem [shape: s32[32,1], index: 1, kind: input, shape index: {}]   ;;  %s383_s2 = inlined_call_operand.vmem [shape: f32[32,1], index: 2, kind: output, shape index: {}]  }
   0x1 LB: > { %s293_s10 = sadd.s32 4294967295, %s333_s9   ;;  %p297_p0 = scmp.ge.s32.totalorder %s333_s9, 1  ;;  %s333_s9 = sphi %s352_s9, %s12_s9  }
   0x2   : > { %p124_p1 = scmp.lt.s32.totalorder %s333_s9, 3 }
   0x4   : > { %p125_p2 = pnand %p297_p0, %p124_p1 }
   0x5   : > { %s298_s11 = sshll.u32 (!%p125_p2), %s293_s10, 1  ;;  %v335_v0 = vmov (!%p125_p2), 0   ;;  %v189_v8 = vlaneseq (!%p125_p2)  ;;  %v336_v16 = vmov (!%p125_p2), 0.0007874016   ;;  %s304_s19 = sshll.u32 (!%p125_p2), %s293_s10, 4  ;;  %vm222_vm3 = vcmask (!%p125_p2), 7168  }
   0x6   : > { %128 = sbr.rel (%p125_p2) target bundleno = 337 (0x151), region = 28  ;;  %p152_p3 = scmp.lt.s32.totalorder (!%p125_p2), %s298_s11, 3  ;;  %317 = vset.pattern.permute.xlu1 (!%p125_p2), %v335_v0  ;;  %318 = vset.pattern.permute.xlu0 (!%p125_p2), %v335_v0  ;;  %v215_v25 = vstv (!%p125_p2), %s304_s19 }
   0x7   : > { %v190_v13 = vand.u32 (!%p125_p2), 127, %v189_v8  ;;  %v213_v24 = vshrl.u32 (!%p125_p2), %v189_v8, 7 }
   0x9   : > { %v216_v26 = vadd.s32 (!%p125_p2), %v215_v25, %v213_v24  ;;  %v214_v27 = vadd.s32 (!%p125_p2), 8, %v213_v24 }
   0xb   : > { %vm218_vm2 = vcmp.lt.s32.totalorder (!%p125_p2), %v216_v26, 30  ;;  %v217_v31 = vadd.s32 (!%p125_p2), %v215_v25, %v214_v27 }
   0xd   : > { %s385_s11 = smov (!%p152_p3, %s298_s11), 3  ;;  %vm219_vm4 = vcmp.lt.s32.totalorder %v217_v31, 30 }
   0xe   : > { %s362_s12 = sshll.u32 %s385_s11, 3 }
   0xf   : > { %s155_s15 = scalar_lea.vmem %s381_s0, %s362_s12  ;;  %s161_s18 = scalar_lea.vmem %s382_s1, %s362_s12 }
  0x10   : > { %v169_v1 = vld [vmem:[%s155_s15] sm:$0xff]  ;;  %v170_v3 = vld [vmem:[%s155_s15 + $0x8] sm:$0xff]  ;;  %s167_s22 = scalar_lea.vmem %s383_s2, %s362_s12 }
  0x11   : > { %171 = vmax.xlane.f32.xlu0 %v169_v1  ;;  %v191_v2 = vld [vmem:[%s161_s18] sm:$0xff]  ;;  %v192_v4 = vld [vmem:[%s161_s18 + $0x8] sm:$0xff] }
  0x12   : > { %194 = vperm.xlu1 %317, %v191_v2  }
  0x15   : > { %173 = vmax.xlane.f32.xlu0 %v170_v3 }
  0x16   : > { %197 = vperm.xlu1 %317, %v192_v4  }
  0x91   : > { %v195_v11 = vpop.permute.xlu1 %194 }
  0x92   : > { %vm199_vm0 = vcmp.eq.s32.totalorder %v190_v13, %v195_v11 }
  0x93   : > { %v201_v17 = vsel %vm199_vm0, 0.9, %v336_v16 }
  0x95   : > { %v198_v14 = vpop.permute.xlu1 %197 }
  0x96   : > { %vm200_vm1 = vcmp.eq.s32.totalorder %v190_v13, %v198_v14 }
  0x97   : > { %v202_v20 = vsel %vm200_vm1, 0.9, %v336_v16 }
  0x9e   : > { %v172_v5 = vpop.xlane.xlu0 %171 }
  0x9f   : > { %v175_v6 = vsub.f32 %v169_v1, %v172_v5 }
  0xa1   : > { %v177_v7 = vmul.f32 1.442695, %v175_v6  ;;  %v203_v18 = vmul.f32 %v201_v17, %v175_v6 }
  0xa2   : > { %v174_v9 = vpop.xlane.xlu0 %173 }
  0xa3   : > { %319 = vpow2.f32 %v177_v7  ;;  %v176_v10 = vsub.f32 %v170_v3, %v174_v9 }
  0xa5   : > { %v179_v12 = vmul.f32 1.442695, %v176_v10  ;;  %v204_v21 = vmul.f32 %v202_v20, %v176_v10 }
  0xa7   : > { %321 = vpow2.f32 %v179_v12 }
  0xad   : > { %v320_v15 = vpop.eup %319 }
  0xae   : > { %181 = vadd.xlane.f32.xlu0 %v320_v15 }
  0xb1   : > { %v322_v19 = vpop.eup %321 }
  0xb2   : > { %205 = vadd.xlane.f32.xlu0 %v203_v18  ;;  %183 = vadd.xlane.f32.xlu1 %v322_v19 }
  0xb6   : > { %207 = vadd.xlane.f32.xlu0 %v204_v21 }
 0x13b   : > { %v182_v22 = vpop.xlane.xlu0 %181 }
 0x13c   : > { %323 = vlog2.f32 %v182_v22 }
 0x13f   : > { %v184_v23 = vpop.xlane.xlu1 %183  ;;  %v206_v29 = vpop.xlane.xlu0 %205 }
 0x140   : > { %325 = vlog2.f32 %v184_v23 }
 0x143   : > { %v208_v36 = vpop.xlane.xlu0 %207 }
 0x146   : > { %v324_v28 = vpop.eup %323 }
 0x147   : > { %v186_v30 = vmul.f32 0.6931472, %v324_v28 }
 0x149   : > { %v209_v32 = vsub.f32 %v186_v30, %v206_v29 }
 0x14a   : > { %v326_v33 = vpop.eup %325 }
 0x14b   : > { %v220_v34 = vsel %vm218_vm2, %v209_v32, 0.0  ;;  %v188_v35 = vmul.f32 0.6931472, %v326_v33 }
 0x14c   : > { %223 = vst.msk [vmem:[%s167_s22] sm:$0xff] %vm222_vm3, %v220_v34 }
 0x14d   : > { %v210_v37 = vsub.f32 %v188_v35, %v208_v36 }
 0x14f   : > { %v221_v38 = vsel %vm219_vm4, %v210_v37, 0.0 }
 0x150   : > { %224 = vst.msk [vmem:[%s167_s22 + $0x8] sm:$0xff] %vm222_vm3, %v221_v38 }
 0x151 PF: > { %s12_s9 = sadd.s32 1, %s333_s9  }
 0x152   : > { %p9_p4 = scmp.ge.s32.totalorder %s12_s9, 4  }
 0x154   :  { %11 = sbr.rel (!%p9_p4) target bundleno = 1 (0x1), region = 61 }

</bundles_post_ra>
